<compile_context>
chip_gen: v5e
topology: v5e:2x2
jax: 0.10.0
libtpu: 0.0.40
codegen_flags: <defaults>
</compile_context>

<pallas_src>
import functools

import jax
import jax.numpy as jnp
from jax import lax
from jax.experimental import pallas as pl
from jax.experimental.pallas import tpu as pltpu


# ---------------------------------------------------------------------------
# Small host-side helpers.
# ---------------------------------------------------------------------------
def _cdiv(a, b):
    return -(-a // b)


def _round_up(a, m):
    return _cdiv(a, m) * m


def _num_megacore_tensorcores():
    """Best-effort: 2 TensorCores share one device on v4/v5p/v7x (megacore)."""
    try:
        kind = jax.devices()[0].device_kind.lower()
    except Exception:
        return 1
    if "v4" in kind or "7" in kind:
        return 2
    if "v5" in kind and "lite" not in kind and "v5e" not in kind:
        return 2  # v5p
    return 1


def _pick_tile(dim, tile_max=512):
    """Tile a K/N dim: keep it whole if small, else a clean 128-multiple divisor."""
    if dim <= tile_max:
        return dim
    for cand in (tile_max, 256, 128):
        if dim % cand == 0:
            return cand
    # TODO(synk): pad awkward (non-multiple-of-128) large dims instead of
    # keeping them fully resident in VMEM.
    return dim


# ---------------------------------------------------------------------------
# One-time parameter preparation (call OUTSIDE the per-call jitted forward).
#   * W cast to the MXU dtype exactly once (no per-call f32->bf16 HBM pass).
#   * BatchNorm1d (eval) folded to scale/shift.
#   * bias / scale / shift packed into one sublane-padded (8, Fout) f32 slab.
# ---------------------------------------------------------------------------
def prepare_params(w, b, gamma, beta, running_mean, running_var, *,
                   eps=1e-5, matmul_dtype=jnp.bfloat16):
    fout = w.shape[1]
    scale = gamma.astype(jnp.float32) * lax.rsqrt(running_var.astype(jnp.float32) + eps)
    shift = beta.astype(jnp.float32) - running_mean.astype(jnp.float32) * scale
    zeros = jnp.zeros((fout,), jnp.float32)
    aux = jnp.stack([b.astype(jnp.float32), scale, shift,
                     zeros, zeros, zeros, zeros, zeros])          # (8, Fout) f32
    return w.astype(matmul_dtype), aux


# ---------------------------------------------------------------------------
# Fused kernel:  y = relu(x @ W + bias) * scale + shift
#   grid = (rows, out-cols, K);  K is a reduction axis ("arbitrary") with an
#   f32 VMEM accumulator; epilogue runs on the last K step only.
# ---------------------------------------------------------------------------
def _linear_bn_kernel(x_ref, w_ref, aux_ref, o_ref, acc_ref):
    @pl.when(pl.program_id(2) == 0)
    def _():
        acc_ref[...] = jnp.zeros_like(acc_ref)

    # MXU: activation tile cast in-kernel (no separate XLA cast of x in HBM);
    # weights are already stored in the matmul dtype.
    acc_ref[...] += jnp.dot(x_ref[...].astype(w_ref.dtype), w_ref[...],
                            preferred_element_type=jnp.float32)

    @pl.when(pl.program_id(2) == pl.num_programs(2) - 1)
    def _():
        bias  = aux_ref[0:1, :]     # (1, tn) f32
        scale = aux_ref[1:2, :]
        shift = aux_ref[2:3, :]
        h = jnp.maximum(acc_ref[...] + bias, 0.0)   # Linear bias + ReLU
        # Dropout(p): inference-mode identity.
        # BatchNorm1d (eval): pre-folded per-feature affine.
        o_ref[...] = (h * scale + shift).astype(o_ref.dtype)


# ---------------------------------------------------------------------------
# Forward wrapper.  `w_prepared` is (Fin, Fout) in the matmul dtype
# (== torch Linear weight.T), `aux` is the (8, Fout) f32 slab from prepare_params.
# ---------------------------------------------------------------------------
def linear_batch_norm(x, w_prepared, aux, *, out_dtype=jnp.bfloat16,
                      tm_max=512, tk_max=512, tn_max=512, num_tensorcores=None):
    B, Fin = x.shape
    Kw, Fout = w_prepared.shape
    assert Fin == Kw and aux.shape == (8, Fout)

    # Row tile: multiple of 8 sublanes, exact-fit when possible.  Single-TC
    # chips (v5e/v6e) get one big tile; megacore chips (v4/v5p/v7x) keep >= 2
    # "parallel" row steps so the second TensorCore is used.
    ncores = (num_tensorcores if num_tensorcores is not None
              else _num_megacore_tensorcores())
    tm = min(tm_max, _round_up(_cdiv(_round_up(B, 8), max(1, ncores)), 8))
    grid_m = _cdiv(B, tm)
    Bp = grid_m * tm
    if Bp != B:                                   # only pad ragged batches;
        x = jnp.pad(x, ((0, Bp - B), (0, 0)))     # padded rows are sliced away.

    tk = _pick_tile(Fin, tk_max)                  # K (reduction) tile
    tn = _pick_tile(Fout, tn_max)                 # N (output-feature) tile
    grid_k = _cdiv(Fin, tk)
    grid_n = _cdiv(Fout, tn)

    # NOTE: the grid-invariant weight/aux blocks could be single-buffered
    # (pipeline_mode=pl.Buffered(1)) to halve their VMEM footprint when Fin*Fout
    # is large; left at the default here (negligible at these shapes).
    out = pl.pallas_call(
        _linear_bn_kernel,
        out_shape=jax.ShapeDtypeStruct((Bp, Fout), out_dtype),
        grid_spec=pltpu.PrefetchScalarGridSpec(
            num_scalar_prefetch=0,
            grid=(grid_m, grid_n, grid_k),
            in_specs=[
                pl.BlockSpec((tm, tk), lambda i, j, k: (i, k)),   # activations (f32)
                pl.BlockSpec((tk, tn), lambda i, j, k: (k, j)),   # bf16 weights
                pl.BlockSpec((8, tn),  lambda i, j, k: (0, j)),   # bias/scale/shift
            ],
            out_specs=pl.BlockSpec((tm, tn), lambda i, j, k: (i, j)),
            scratch_shapes=[pltpu.VMEM((tm, tn), jnp.float32)],
        ),
        compiler_params=pltpu.CompilerParams(
            dimension_semantics=("parallel", "parallel", "arbitrary")),
    )(x, w_prepared, aux)

    return out if Bp == B else out[:B]


# ---------------------------------------------------------------------------
# Demo / self-check.
# ---------------------------------------------------------------------------
if __name__ == "__main__":
    # Lane/sublane-friendly small shapes: 512 rows, in=256, out=128.
    B, Fin, Fout = 512, 256, 128
    dropout_p = 0.25          # inference => identity
    constant_size = True      # => BatchNorm1d branch
    eps = 1e-5

    key = jax.random.PRNGKey(0)
    kx, kw, kb, kg, kbt, km, kv = jax.random.split(key, 7)
    s = 1.0 / (Fin ** 0.5)
    x = jax.random.normal(kx, (B, Fin), jnp.float32)
    w = jax.random.uniform(kw, (Fin, Fout), jnp.float32, -s, s)   # torch weight.T
    b = jax.random.uniform(kb, (Fout,), jnp.float32, -s, s)
    gamma = 1.0 + 0.1 * jax.random.normal(kg, (Fout,), jnp.float32)
    beta = 0.1 * jax.random.normal(kbt, (Fout,), jnp.float32)
    running_mean = 0.1 * jax.random.normal(km, (Fout,), jnp.float32)
    running_var = jax.random.uniform(kv, (Fout,), jnp.float32, 0.5, 1.5)

    # One-time parameter prep (outside the per-call forward).
    w_p, aux_p = prepare_params(w, b, gamma, beta, running_mean, running_var,
                                eps=eps, matmul_dtype=jnp.bfloat16)

    fwd = jax.jit(functools.partial(linear_batch_norm, out_dtype=jnp.bfloat16))
    y = jax.block_until_ready(fwd(x, w_p, aux_p))
    assert y.shape == (B, Fout) and y.dtype == jnp.bfloat16

    # Pure-JAX reference: same bf16 matmul operands / f32 accumulation,
    # f32 epilogue with the UN-folded BatchNorm formula (checks the folding).
    h = jnp.dot(x.astype(jnp.bfloat16), w.astype(jnp.bfloat16),
                preferred_element_type=jnp.float32)
    h = jnp.maximum(h + b[None, :], 0.0)
    ref = ((h - running_mean[None, :])
           * (gamma[None, :] * lax.rsqrt(running_var[None, :] + eps))
           + beta[None, :])

    y32 = y.astype(jnp.float32)
    assert bool(jnp.all(jnp.isfinite(y32)))
    assert bool(jnp.allclose(y32, ref, atol=2e-2, rtol=2e-2))
    print("KERNEL_OK")
</pallas_src>

<mosaic_0001>
module attributes {stable_mosaic.version = 11 : i64} {
  func.func @_linear_bn_kernel(%arg0: i32, %arg1: i32, %arg2: i32, %arg3: memref<512x256xf32, #tpu.memory_space<vmem>>, %arg4: memref<256x128xbf16, #tpu.memory_space<vmem>>, %arg5: memref<8x128xf32, #tpu.memory_space<vmem>>, %arg6: memref<512x128xbf16, #tpu.memory_space<vmem>>, %arg7: memref<512x128xf32, #tpu.memory_space<vmem>>) attributes {dimension_semantics = [#tpu.dimension_semantics<parallel>, #tpu.dimension_semantics<parallel>, #tpu.dimension_semantics<arbitrary>], iteration_bounds = array<i64: 1, 1, 1>, scalar_prefetch = 0 : i64, scratch_operands = 1 : i64, tpu.core_type = #tpu.core_type<tc>, window_params = [{transform_indices = @transform_0, window_bounds = array<i64: 512, 256>}, {transform_indices = @transform_1, window_bounds = array<i64: 256, 128>}, {transform_indices = @transform_2, window_bounds = array<i64: 8, 128>}, {transform_indices = @transform_3, window_bounds = array<i64: 512, 128>}]} {
    %c0_i32 = arith.constant 0 : i32
    %0 = arith.cmpi eq, %arg2, %c0_i32 : i32
    %1 = arith.extui %0 : i1 to i32
    %c0_i32_0 = arith.constant 0 : i32
    %2 = arith.cmpi ne, %1, %c0_i32_0 : i32
    scf.if %2 {
      %cst_10 = arith.constant 0.000000e+00 : f32
      %13 = vector.broadcast %cst_10 : f32 to vector<512x128xf32>
      %c0_11 = arith.constant 0 : index
      %c0_12 = arith.constant 0 : index
      %14 = vector.load %arg7[%c0_11, %c0_12] : memref<512x128xf32, #tpu.memory_space<vmem>>, vector<512x128xf32>
      tpu.vector_store %arg7[%c0_11, %c0_12], %13 {strides = array<i32>} : memref<512x128xf32, #tpu.memory_space<vmem>>, vector<512x128xf32>,
    } else {
    }
    %c0 = arith.constant 0 : index
    %c0_1 = arith.constant 0 : index
    %3 = vector.load %arg7[%c0, %c0_1] : memref<512x128xf32, #tpu.memory_space<vmem>>, vector<512x128xf32>
    %c0_2 = arith.constant 0 : index
    %c0_3 = arith.constant 0 : index
    %4 = vector.load %arg3[%c0_2, %c0_3] : memref<512x256xf32, #tpu.memory_space<vmem>>, vector<512x256xf32>
    %5 = arith.truncf %4 : vector<512x256xf32> to vector<512x256xbf16>
    %c0_4 = arith.constant 0 : index
    %c0_5 = arith.constant 0 : index
    %6 = vector.load %arg4[%c0_4, %c0_5] : memref<256x128xbf16, #tpu.memory_space<vmem>>, vector<256x128xbf16>
    %cst = arith.constant dense<0.000000e+00> : vector<512x128xf32>
    %7 = tpu.matmul %5, %6, %cst {dimension_numbers = #tpu.dot_dimension_numbers<[1], [0], [0], [1], [0, 0, 1, 1], [], []>} : vector<512x256xbf16>, vector<256x128xbf16>, vector<512x128xf32> -> vector<512x128xf32>
    %8 = arith.addf %3, %7 : vector<512x128xf32>
    %c0_6 = arith.constant 0 : index
    %c0_7 = arith.constant 0 : index
    %9 = vector.load %arg7[%c0_6, %c0_7] : memref<512x128xf32, #tpu.memory_space<vmem>>, vector<512x128xf32>
    tpu.vector_store %arg7[%c0_6, %c0_7], %8 {strides = array<i32>} : memref<512x128xf32, #tpu.memory_space<vmem>>, vector<512x128xf32>,
    %c0_i32_8 = arith.constant 0 : i32
    %10 = arith.cmpi eq, %arg2, %c0_i32_8 : i32
    %11 = arith.extui %10 : i1 to i32
    %c0_i32_9 = arith.constant 0 : i32
    %12 = arith.cmpi ne, %11, %c0_i32_9 : i32
    scf.if %12 {
      %c0_10 = arith.constant 0 : index
      %c0_11 = arith.constant 0 : index
      %13 = vector.load %arg5[%c0_10, %c0_11] : memref<8x128xf32, #tpu.memory_space<vmem>>, vector<1x128xf32>
      %c1 = arith.constant 1 : index
      %c0_12 = arith.constant 0 : index
      %14 = vector.load %arg5[%c1, %c0_12] : memref<8x128xf32, #tpu.memory_space<vmem>>, vector<1x128xf32>
      %c2 = arith.constant 2 : index
      %c0_13 = arith.constant 0 : index
      %15 = vector.load %arg5[%c2, %c0_13] : memref<8x128xf32, #tpu.memory_space<vmem>>, vector<1x128xf32>
      %c0_14 = arith.constant 0 : index
      %c0_15 = arith.constant 0 : index
      %16 = vector.load %arg7[%c0_14, %c0_15] : memref<512x128xf32, #tpu.memory_space<vmem>>, vector<512x128xf32>
      %17 = vector.broadcast %13 : vector<1x128xf32> to vector<512x128xf32>
      %18 = arith.addf %16, %17 : vector<512x128xf32>
      %cst_16 = arith.constant 0.000000e+00 : f32
      %19 = vector.broadcast %cst_16 : f32 to vector<512x128xf32>
      %20 = arith.maximumf %18, %19 : vector<512x128xf32>
      %21 = vector.broadcast %14 : vector<1x128xf32> to vector<512x128xf32>
      %22 = arith.mulf %20, %21 : vector<512x128xf32>
      %23 = vector.broadcast %15 : vector<1x128xf32> to vector<512x128xf32>
      %24 = arith.addf %22, %23 : vector<512x128xf32>
      %25 = arith.truncf %24 : vector<512x128xf32> to vector<512x128xbf16>
      %c0_17 = arith.constant 0 : index
      %c0_18 = arith.constant 0 : index
      %26 = vector.load %arg6[%c0_17, %c0_18] : memref<512x128xbf16, #tpu.memory_space<vmem>>, vector<512x128xbf16>
      tpu.vector_store %arg6[%c0_17, %c0_18], %25 {strides = array<i32>} : memref<512x128xbf16, #tpu.memory_space<vmem>>, vector<512x128xbf16>,
    } else {
    }
    return
  }
  func.func @transform_0(%arg0: i32, %arg1: i32, %arg2: i32) -> (i32, i32) {
    %c0_i32 = arith.constant 0 : i32
    return %arg0, %arg2 : i32, i32
  }
  func.func @transform_1(%arg0: i32, %arg1: i32, %arg2: i32) -> (i32, i32) {
    %c0_i32 = arith.constant 0 : i32
    return %arg2, %arg1 : i32, i32
  }
  func.func @transform_2(%arg0: i32, %arg1: i32, %arg2: i32) -> (i32, i32) {
    %c0_i32 = arith.constant 0 : i32
    %c0_i32_0 = arith.constant 0 : i32
    return %c0_i32, %arg1 : i32, i32
  }
  func.func @transform_3(%arg0: i32, %arg1: i32, %arg2: i32) -> (i32, i32) {
    %c0_i32 = arith.constant 0 : i32
    return %arg0, %arg1 : i32, i32
  }
}

</mosaic_0001>

<bundles_post_ra>
// kernel: linear_batch_norm.1
= control target key start
LH: loop header
LB: loop body
LE: loop exit
PB: predicated region body
PF: predicated region fallthrough
CT: control target
= control target key end

     0   :  { %8 = vsyncpa [#allocation4], 0  ;;  %s2108_s0 = inlined_call_operand.hbm [shape: f32[512,256], index: 0, kind: input, shape index: {}]   ;;  %s2109_s1 = inlined_call_operand.hbm [shape: bf16[256,128], index: 1, kind: input, shape index: {}]   ;;  %s2110_s2 = inlined_call_operand.hbm [shape: f32[8,128], index: 2, kind: input, shape index: {}]   ;;  %s2111_s3 = inlined_call_operand.hbm [shape: bf16[512,128], index: 3, kind: output, shape index: {}]  }
   0x1   :  { %9 = vsyncpa [#allocation7], 0  ;;  %s28_s14 = sshll.u32 %s2109_s1, 4  ;;  %s29_s14 = int_to_ptr.hbm [resolvable:$true] %s28_s14 }
   0x2   :  { %10 = vsyncpa [#allocation5], 0  ;;  %s1858_s15 = smov [#allocation6]   ;;  %s15_s19 = sshll.u32 %s2108_s0, 4  ;;  %s16_s19 = int_to_ptr.hbm [resolvable:$true] %s15_s19 }
   0x3   :  { %s30_s16 = sshll.u32 %s1858_s15, 4  ;;  %s1859_s20 = smov 64   ;;  %s31_s16 = int_to_ptr.vmem [resolvable:$true] %s30_s16 }
   0x4   :  { %s1860_s21 = smov 4   ;;  %s1861_s22 = smov [#allocation3]  }
   0x5   :  { %36 = dma.hbm_to_vmem [thread:$0]  %s29_s14, 2048, %s31_s16, [#allocation7], %s1859_s20, %s1859_s20, %s1860_s21  }
   0x6   :  { %s17_s23 = sshll.u32 %s1861_s22, 4  ;;  %s1862_s1 = smov 256   ;;  %s18_s23 = int_to_ptr.vmem [resolvable:$true] %s17_s23 }
   0x7   :  { %s1863_s24 = smov 16   ;;  %s42_s27 = sshll.u32 %s2110_s2, 4  ;;  %s43_s27 = int_to_ptr.hbm [resolvable:$true] %s42_s27 }
   0x8   :  { %23 = dma.hbm_to_vmem [thread:$0]  %s16_s19, 16384, %s18_s23, [#allocation4], %s1862_s1, %s1862_s1, %s1863_s24  }
   0x9   :  { %s1864_s28 = smov [#allocation8]  }
   0xa   :  { %s44_s0 = sshll.u32 %s1864_s28, 4  ;;  %s45_s0 = int_to_ptr.vmem [resolvable:$true] %s44_s0 }
   0xb   :  { %47 = dma.hbm_to_vmem [thread:$0]  %s43_s27, 128, %s45_s0, [#allocation7]  }
   0xc   :  { %1852 = dma.done.wait [#allocation4], 16384  }
   0xd   :  { %1853 = vsyncadd [#allocation4], 4294950912 }
   0xe   :  { %1854 = dma.done.wait [#allocation7], 2176  }
   0xf   :  { %1855 = vsyncadd [#allocation7], 4294965120  ;;  %v1526_v0 = vld [vmem:[#allocation6 + $0x38] sm:$0xff]  ;;  %v1525_v2 = vld [vmem:[#allocation6 + $0x30] sm:$0xff]  ;;  %s1865_s2 = smov [#allocation9]   ;;  %s1441_s5 = sshll.u32 %s2111_s3, 4  ;;  %s1442_s5 = int_to_ptr.hbm [resolvable:$true] %s1441_s5 }
  0x10   :  { %v1534_v1 = vld [vmem:[#allocation6 + $0x78] sm:$0xff]  ;;  %512 = vmatpush.bf16.msra.mxu0 %v1526_v0  ;;  %1726 = vmatpush.bf16.msra.mxu2 %v1526_v0  ;;  %v1533_v3 = vld [vmem:[#allocation6 + $0x70] sm:$0xff]  ;;  %v1524_v4 = vld [vmem:[#allocation6 + $0x28] sm:$0xff]  ;;  %s1439_s29 = sshll.u32 %s1865_s2, 4  ;;  %s1440_s29 = int_to_ptr.vmem [resolvable:$true] %s1439_s29 }
  0x11   :  { %681 = vmatpush.bf16.msra.mxu1 %v1534_v1  ;;  %1734 = vmatpush.bf16.msra.mxu3 %v1534_v1  ;;  %v1532_v5 = vld [vmem:[#allocation6 + $0x68] sm:$0xff]  ;;  %v1523_v6 = vld [vmem:[#allocation6 + $0x20] sm:$0xff]  ;;  %v1522_v8 = vld [vmem:[#allocation6 + $0x18] sm:$0xff] }
  0x12   :  { %v1531_v7 = vld [vmem:[#allocation6 + $0x60] sm:$0xff]  ;;  %v1530_v9 = vld [vmem:[#allocation6 + $0x58] sm:$0xff]  ;;  %v1521_v10 = vld [vmem:[#allocation6 + $0x10] sm:$0xff] }
  0x13   :  { %v1529_v11 = vld [vmem:[#allocation6 + $0x50] sm:$0xff]  ;;  %v1520_v12 = vld [vmem:[#allocation6 + $0x8] sm:$0xff]  ;;  %v1519_v14 = vld [vmem:[#allocation6] sm:$0xff] }
  0x14   :  { %513 = vmatpush.bf16.msra.mxu0 %v1525_v2  ;;  %1727 = vmatpush.bf16.msra.mxu2 %v1525_v2  ;;  %v1528_v13 = vld [vmem:[#allocation6 + $0x48] sm:$0xff]  ;;  %v1527_v15 = vld [vmem:[#allocation6 + $0x40] sm:$0xff]  ;;  %v194_v17 = vld [vmem:[#allocation3 + $0x10] sm:$0xff] }
  0x15   :  { %682 = vmatpush.bf16.msra.mxu1 %v1533_v3  ;;  %1735 = vmatpush.bf16.msra.mxu3 %v1533_v3  ;;  %v192_v16 = vld [vmem:[#allocation3] sm:$0xff]  ;;  %v258_v19 = vld [vmem:[#allocation3 + $0x210] sm:$0xff]  ;;  %v193_v20 = vld [vmem:[#allocation3 + $0x8] sm:$0xff] }
  0x16   :  { %v256_v18 = vld [vmem:[#allocation3 + $0x200] sm:$0xff]  ;;  %v195_v21 = vld [vmem:[#allocation3 + $0x18] sm:$0xff]  ;;  %v257_v22 = vld [vmem:[#allocation3 + $0x208] sm:$0xff]  ;;  %v320_v24 = vpack.c.bf16 %v194_v17, %v192_v16 }
  0x17   :  { %v259_v23 = vld [vmem:[#allocation3 + $0x218] sm:$0xff]  ;;  %v352_v25 = vpack.c.bf16 %v258_v19, %v256_v18  ;;  %v321_v26 = vpack.c.bf16 %v195_v21, %v193_v20  ;;  %v196_v28 = vld [vmem:[#allocation3 + $0x20] sm:$0xff]  ;;  %v198_v29 = vld [vmem:[#allocation3 + $0x30] sm:$0xff] }
  0x18   :  { %514 = vmatpush.bf16.msra.mxu0 %v1524_v4  ;;  %1728 = vmatpush.bf16.msra.mxu2 %v1524_v4  ;;  %v353_v27 = vpack.c.bf16 %v259_v23, %v257_v22  ;;  %v260_v30 = vld [vmem:[#allocation3 + $0x220] sm:$0xff]  ;;  %v262_v31 = vld [vmem:[#allocation3 + $0x230] sm:$0xff]  ;;  %v197_v32 = vld [vmem:[#allocation3 + $0x28] sm:$0xff]  ;;  %v322_v36 = vpack.c.bf16 %v198_v29, %v196_v28 }
  0x19   :  { %683 = vmatpush.bf16.msra.mxu1 %v1532_v5  ;;  %1736 = vmatpush.bf16.msra.mxu3 %v1532_v5  ;;  %v199_v33 = vld [vmem:[#allocation3 + $0x38] sm:$0xff]  ;;  %v261_v34 = vld [vmem:[#allocation3 + $0x228] sm:$0xff]  ;;  %v354_v37 = vpack.c.bf16 %v262_v31, %v260_v30  ;;  %v200_v40 = vld [vmem:[#allocation3 + $0x40] sm:$0xff] }
  0x1a   :  { %v263_v35 = vld [vmem:[#allocation3 + $0x238] sm:$0xff]  ;;  %v323_v38 = vpack.c.bf16 %v199_v33, %v197_v32  ;;  %v202_v41 = vld [vmem:[#allocation3 + $0x50] sm:$0xff]  ;;  %v264_v42 = vld [vmem:[#allocation3 + $0x240] sm:$0xff] }
  0x1b   :  { %v355_v39 = vpack.c.bf16 %v263_v35, %v261_v34  ;;  %v266_v43 = vld [vmem:[#allocation3 + $0x250] sm:$0xff]  ;;  %v201_v44 = vld [vmem:[#allocation3 + $0x48] sm:$0xff]  ;;  %v203_v45 = vld [vmem:[#allocation3 + $0x58] sm:$0xff]  ;;  %v324_v48 = vpack.c.bf16 %v202_v41, %v200_v40 }
  0x1c   :  { %515 = vmatpush.bf16.msra.mxu0 %v1523_v6  ;;  %1729 = vmatpush.bf16.msra.mxu2 %v1523_v6  ;;  %v265_v46 = vld [vmem:[#allocation3 + $0x248] sm:$0xff]  ;;  %v267_v47 = vld [vmem:[#allocation3 + $0x258] sm:$0xff]  ;;  %v356_v49 = vpack.c.bf16 %v266_v43, %v264_v42  ;;  %v325_v50 = vpack.c.bf16 %v203_v45, %v201_v44  ;;  %v204_v52 = vld [vmem:[#allocation3 + $0x60] sm:$0xff] }
  0x1d   :  { %684 = vmatpush.bf16.msra.mxu1 %v1531_v7  ;;  %1737 = vmatpush.bf16.msra.mxu3 %v1531_v7  ;;  %v357_v51 = vpack.c.bf16 %v267_v47, %v265_v46  ;;  %v206_v53 = vld [vmem:[#allocation3 + $0x70] sm:$0xff]  ;;  %v268_v54 = vld [vmem:[#allocation3 + $0x260] sm:$0xff]  ;;  %v205_v56 = vld [vmem:[#allocation3 + $0x68] sm:$0xff] }
  0x1e   :  { %v270_v55 = vld [vmem:[#allocation3 + $0x270] sm:$0xff]  ;;  %v207_v57 = vld [vmem:[#allocation3 + $0x78] sm:$0xff]  ;;  %v269_v58 = vld [vmem:[#allocation3 + $0x268] sm:$0xff]  ;;  %v326_v60 = vpack.c.bf16 %v206_v53, %v204_v52 }
  0x1f   :  { %v271_v59 = vld [vmem:[#allocation3 + $0x278] sm:$0xff]  ;;  %v358_v61 = vpack.c.bf16 %v270_v55, %v268_v54  ;;  %v327_v62 = vpack.c.bf16 %v207_v57, %v205_v56  ;;  %v208_v0 = vld [vmem:[#allocation3 + $0x80] sm:$0xff]  ;;  %v210_v1 = vld [vmem:[#allocation3 + $0x90] sm:$0xff] }
  0x20   :  { %516 = vmatpush.bf16.msra.mxu0 %v1522_v8  ;;  %1730 = vmatpush.bf16.msra.mxu2 %v1522_v8  ;;  %v359_v63 = vpack.c.bf16 %v271_v59, %v269_v58  ;;  %v272_v2 = vld [vmem:[#allocation3 + $0x280] sm:$0xff]  ;;  %v274_v3 = vld [vmem:[#allocation3 + $0x290] sm:$0xff]  ;;  %v209_v4 = vld [vmem:[#allocation3 + $0x88] sm:$0xff]  ;;  %v328_v8 = vpack.c.bf16 %v210_v1, %v208_v0 }
  0x21   :  { %685 = vmatpush.bf16.msra.mxu1 %v1530_v9  ;;  %1738 = vmatpush.bf16.msra.mxu3 %v1530_v9  ;;  %v211_v5 = vld [vmem:[#allocation3 + $0x98] sm:$0xff]  ;;  %v273_v6 = vld [vmem:[#allocation3 + $0x288] sm:$0xff]  ;;  %v360_v9 = vpack.c.bf16 %v274_v3, %v272_v2 }
  0x22   :  { %v275_v7 = vld [vmem:[#allocation3 + $0x298] sm:$0xff]  ;;  %v213_v16 = vld [vmem:[#allocation3 + $0xa8] sm:$0xff] }
  0x23   :  { %v215_v17 = vld [vmem:[#allocation3 + $0xb8] sm:$0xff]  ;;  %v277_v18 = vld [vmem:[#allocation3 + $0x2a8] sm:$0xff] }
  0x24   :  { %517 = vmatpush.bf16.msra.mxu0 %v1521_v10  ;;  %1731 = vmatpush.bf16.msra.mxu2 %v1521_v10  ;;  %v329_v10 = vpack.c.bf16 %v211_v5, %v209_v4  ;;  %v279_v19 = vld [vmem:[#allocation3 + $0x2b8] sm:$0xff]  ;;  %v331_v22 = vpack.c.bf16 %v215_v17, %v213_v16  ;;  %v217_v28 = vld [vmem:[#allocation3 + $0xc8] sm:$0xff] }
  0x25   :  { %686 = vmatpush.bf16.msra.mxu1 %v1529_v11  ;;  %1739 = vmatpush.bf16.msra.mxu3 %v1529_v11  ;;  %v361_v11 = vpack.c.bf16 %v275_v7, %v273_v6  ;;  %v363_v23 = vpack.c.bf16 %v279_v19, %v277_v18  ;;  %v219_v29 = vld [vmem:[#allocation3 + $0xd8] sm:$0xff]  ;;  %v281_v30 = vld [vmem:[#allocation3 + $0x2c8] sm:$0xff]  ;;  %v1901_v7 = vld [vmem:[#allocation8 + $0x1] ss:$0 sm:$0xff] }
  0x26   :  { %v283_v31 = vld [vmem:[#allocation3 + $0x2d8] sm:$0xff]  ;;  %v333_v34 = vpack.c.bf16 %v219_v29, %v217_v28  ;;  %v221_v40 = vld [vmem:[#allocation3 + $0xe8] sm:$0xff] }
  0x27   :  { %v365_v35 = vpack.c.bf16 %v283_v31, %v281_v30  ;;  %v223_v41 = vld [vmem:[#allocation3 + $0xf8] sm:$0xff]  ;;  %v285_v42 = vld [vmem:[#allocation3 + $0x2e8] sm:$0xff] }
  0x28   :  { %518 = vmatpush.bf16.msra.mxu0 %v1520_v12  ;;  %1732 = vmatpush.bf16.msra.mxu2 %v1520_v12  ;;  %v212_v12 = vld [vmem:[#allocation3 + $0xa0] sm:$0xff]  ;;  %v287_v43 = vld [vmem:[#allocation3 + $0x2f8] sm:$0xff]  ;;  %v335_v46 = vpack.c.bf16 %v223_v41, %v221_v40  ;;  %v225_v52 = vld [vmem:[#allocation3 + $0x108] sm:$0xff] }
  0x29   :  { %687 = vmatpush.bf16.msra.mxu1 %v1528_v13  ;;  %1740 = vmatpush.bf16.msra.mxu3 %v1528_v13  ;;  %v214_v13 = vld [vmem:[#allocation3 + $0xb0] sm:$0xff]  ;;  %v367_v47 = vpack.c.bf16 %v287_v43, %v285_v42  ;;  %v227_v53 = vld [vmem:[#allocation3 + $0x118] sm:$0xff]  ;;  %v289_v54 = vld [vmem:[#allocation3 + $0x308] sm:$0xff] }
  0x2a   :  { %v330_v20 = vpack.c.bf16 %v214_v13, %v212_v12  ;;  %v291_v55 = vld [vmem:[#allocation3 + $0x318] sm:$0xff]  ;;  %v337_v59 = vpack.c.bf16 %v227_v53, %v225_v52  ;;  %v293_v17 = vld [vmem:[#allocation3 + $0x328] sm:$0xff]  ;;  %v232_v52 = vld [vmem:[#allocation3 + $0x140] sm:$0xff] }
  0x2b   :  { %v231_v16 = vld [vmem:[#allocation3 + $0x138] sm:$0xff]  ;;  %v234_v53 = vld [vmem:[#allocation3 + $0x150] sm:$0xff] }
  0x2c   :  { %519 = vmatpush.bf16.msra.mxu0 %v1519_v14  ;;  %1733 = vmatpush.bf16.msra.mxu2 %v1519_v14  ;;  %v276_v14 = vld [vmem:[#allocation3 + $0x2a0] sm:$0xff]  ;;  %v295_v18 = vld [vmem:[#allocation3 + $0x338] sm:$0xff] }
  0x2d   :  { %688 = vmatpush.bf16.msra.mxu1 %v1527_v15  ;;  %1741 = vmatpush.bf16.msra.mxu3 %v1527_v15  ;;  %v278_v15 = vld [vmem:[#allocation3 + $0x2b0] sm:$0xff]  ;;  %v371_v31 = vpack.c.bf16 %v295_v18, %v293_v17 }
  0x2e   :  { %v362_v21 = vpack.c.bf16 %v278_v15, %v276_v14  ;;  %v294_v14 = vld [vmem:[#allocation3 + $0x330] sm:$0xff]  ;;  %v229_v15 = vld [vmem:[#allocation3 + $0x128] sm:$0xff] }
  0x2f   :  { %520 = vmatmul.bf16.vlgmr.msra.gmra.mxu0 %v320_v24  ;;  %600 = vmatmul.bf16.vlgmr.msra.gmra.mxu2 %v352_v25  ;;  %v216_v24 = vld [vmem:[#allocation3 + $0xc0] sm:$0xff]  ;;  %v218_v25 = vld [vmem:[#allocation3 + $0xd0] sm:$0xff] }
  0x30   :  { %689 = vmatmul.bf16.vlgmr.msra.gmra.mxu1 %v321_v26  ;;  %769 = vmatmul.bf16.vlgmr.msra.gmra.mxu3 %v353_v27  ;;  %v280_v26 = vld [vmem:[#allocation3 + $0x2c0] sm:$0xff]  ;;  %v282_v27 = vld [vmem:[#allocation3 + $0x2d0] sm:$0xff]  ;;  %v332_v32 = vpack.c.bf16 %v218_v25, %v216_v24 }
  0x31   :  { %v364_v33 = vpack.c.bf16 %v282_v27, %v280_v26  ;;  %v339_v26 = vpack.c.bf16 %v231_v16, %v229_v15 }
  0x3f   :  { %525 = vmatmul.bf16.gmra.mxu0 %v322_v36  ;;  %605 = vmatmul.bf16.gmra.mxu2 %v354_v37  ;;  %v220_v36 = vld [vmem:[#allocation3 + $0xe0] sm:$0xff]  ;;  %v222_v37 = vld [vmem:[#allocation3 + $0xf0] sm:$0xff] }
  0x40   :  { %694 = vmatmul.bf16.gmra.mxu1 %v323_v38  ;;  %774 = vmatmul.bf16.gmra.mxu3 %v355_v39  ;;  %v284_v38 = vld [vmem:[#allocation3 + $0x2e0] sm:$0xff]  ;;  %v286_v39 = vld [vmem:[#allocation3 + $0x2f0] sm:$0xff]  ;;  %v334_v44 = vpack.c.bf16 %v222_v37, %v220_v36 }
  0x41   :  { %v366_v45 = vpack.c.bf16 %v286_v39, %v284_v38 }
  0x4f   :  { %530 = vmatmul.bf16.gmra.mxu0 %v324_v48  ;;  %610 = vmatmul.bf16.gmra.mxu2 %v356_v49  ;;  %v224_v48 = vld [vmem:[#allocation3 + $0x100] sm:$0xff]  ;;  %v226_v49 = vld [vmem:[#allocation3 + $0x110] sm:$0xff] }
  0x50   :  { %699 = vmatmul.bf16.gmra.mxu1 %v325_v50  ;;  %779 = vmatmul.bf16.gmra.mxu3 %v357_v51  ;;  %v288_v50 = vld [vmem:[#allocation3 + $0x300] sm:$0xff]  ;;  %v290_v51 = vld [vmem:[#allocation3 + $0x310] sm:$0xff]  ;;  %v336_v56 = vpack.c.bf16 %v226_v49, %v224_v48 }
  0x51   :  { %v368_v57 = vpack.c.bf16 %v290_v51, %v288_v50 }
  0x5f   :  { %535 = vmatmul.bf16.gmra.mxu0 %v326_v60  ;;  %615 = vmatmul.bf16.gmra.mxu2 %v358_v61  ;;  %v369_v60 = vpack.c.bf16 %v291_v55, %v289_v54  ;;  %v296_v54 = vld [vmem:[#allocation3 + $0x340] sm:$0xff] }
  0x60   :  { %704 = vmatmul.bf16.gmra.mxu1 %v327_v62  ;;  %784 = vmatmul.bf16.gmra.mxu3 %v359_v63  ;;  %v1898_v63 = vld [vmem:[#allocation8] ss:$0 sm:$0xff] }
  0x6f   :  { %540 = vmatmul.bf16.gmra.mxu0 %v328_v8  ;;  %620 = vmatmul.bf16.gmra.mxu2 %v360_v9  ;;  %v228_v9 = vld [vmem:[#allocation3 + $0x120] sm:$0xff] }
  0x70   :  { %709 = vmatmul.bf16.gmra.mxu1 %v329_v10  ;;  %789 = vmatmul.bf16.gmra.mxu3 %v361_v11  ;;  %v230_v10 = vld [vmem:[#allocation3 + $0x130] sm:$0xff]  ;;  %v292_v11 = vld [vmem:[#allocation3 + $0x320] sm:$0xff] }
  0x71   :  { %v338_v24 = vpack.c.bf16 %v230_v10, %v228_v9  ;;  %v370_v25 = vpack.c.bf16 %v294_v14, %v292_v11 }
  0x7f   :  { %545 = vmatmul.bf16.gmra.mxu0 %v330_v20  ;;  %625 = vmatmul.bf16.gmra.mxu2 %v362_v21  ;;  %v1906_v20 = vld [vmem:[#allocation8 + $0x2] ss:$0 sm:$0xff] }
  0x80   :  { %714 = vmatmul.bf16.gmra.mxu1 %v331_v22  ;;  %794 = vmatmul.bf16.gmra.mxu3 %v363_v23 }
  0x8f   :  { %550 = vmatmul.bf16.gmra.mxu0 %v332_v32  ;;  %630 = vmatmul.bf16.gmra.mxu2 %v364_v33 }
  0x90   :  { %719 = vmatmul.bf16.gmra.mxu1 %v333_v34  ;;  %799 = vmatmul.bf16.gmra.mxu3 %v365_v35 }
  0x9f   :  { %555 = vmatmul.bf16.gmra.mxu0 %v334_v44  ;;  %635 = vmatmul.bf16.gmra.mxu2 %v366_v45 }
  0xa0   :  { %724 = vmatmul.bf16.gmra.mxu1 %v335_v46  ;;  %804 = vmatmul.bf16.gmra.mxu3 %v367_v47 }
  0xac   :  { %v521_v58 = vpop.f32.mrf.mxu0 }
  0xad   :  { %v690_v61 = vpop.f32.mrf.mxu1 }
  0xae   :  { %v691_v62 = vadd.f32 %v690_v61, %v521_v58  ;;  %v233_v58 = vld [vmem:[#allocation3 + $0x148] sm:$0xff]  ;;  %v299_v61 = vld [vmem:[#allocation3 + $0x358] sm:$0xff] }
  0xaf   :  { %560 = vmatmul.bf16.gmra.mxu0 %v336_v56  ;;  %640 = vmatmul.bf16.gmra.mxu2 %v368_v57  ;;  %v298_v57 = vld [vmem:[#allocation3 + $0x350] sm:$0xff] }
  0xb0   :  { %729 = vmatmul.bf16.gmra.mxu1 %v337_v59  ;;  %809 = vmatmul.bf16.gmra.mxu3 %v369_v60  ;;  %v1049_v0 = vadd.f32 %v1898_v63, %v691_v62  ;;  %v235_v59 = vld [vmem:[#allocation3 + $0x158] sm:$0xff]  ;;  %v297_v60 = vld [vmem:[#allocation3 + $0x348] sm:$0xff] }
  0xb1   :  { %v373_v11 = vpack.c.bf16 %v299_v61, %v297_v60 }
  0xb2   :  { %v601_v1 = vpop.f32.mrf.mxu2  ;;  %v1113_v6 = vmax.f32 %v1049_v0, 0.0 }
  0xb3   :  { %v770_v2 = vpop.f32.mrf.mxu3 }
  0xb4   :  { %v771_v3 = vadd.f32 %v770_v2, %v601_v1  ;;  %v523_v4 = vpop.f32.mrf.mxu0  ;;  %v1178_v19 = vmul.f32 %v1901_v7, %v1113_v6 }
  0xb5   :  { %v692_v5 = vpop.f32.mrf.mxu1 }
  0xb6   :  { %v693_v8 = vadd.f32 %v692_v5, %v523_v4  ;;  %v1081_v12 = vadd.f32 %v1898_v63, %v771_v3  ;;  %v1243_v33 = vadd.f32 %v1906_v20, %v1178_v19  ;;  %v340_v3 = vpack.c.bf16 %v234_v53, %v232_v52 }
  0xb7   :  { %v372_v4 = vpack.c.bf16 %v298_v57, %v296_v54  ;;  %v341_v5 = vpack.c.bf16 %v235_v59, %v233_v58 }
  0xb8   :  { %v1050_v13 = vadd.f32 %v1898_v63, %v693_v8  ;;  %v1145_v27 = vmax.f32 %v1081_v12, 0.0 }
  0xba   :  { %v1114_v21 = vmax.f32 %v1050_v13, 0.0  ;;  %v603_v22 = vpop.f32.mrf.mxu2  ;;  %v1210_v37 = vmul.f32 %v1901_v7, %v1145_v27 }
  0xbb   :  { %v772_v23 = vpop.f32.mrf.mxu3 }
  0xbc   :  { %v1179_v28 = vmul.f32 %v1901_v7, %v1114_v21  ;;  %v773_v29 = vadd.f32 %v772_v23, %v603_v22  ;;  %v526_v30 = vpop.f32.mrf.mxu0  ;;  %v1275_v44 = vadd.f32 %v1906_v20, %v1210_v37 }
  0xbd   :  { %v695_v32 = vpop.f32.mrf.mxu1 }
  0xbe   :  { %v1244_v34 = vadd.f32 %v1906_v20, %v1179_v28  ;;  %v1082_v35 = vadd.f32 %v1898_v63, %v773_v29  ;;  %v696_v36 = vadd.f32 %v695_v32, %v526_v30 }
  0xbf   :  { %565 = vmatmul.bf16.gmra.mxu0 %v338_v24  ;;  %645 = vmatmul.bf16.gmra.mxu2 %v370_v25 }
  0xc0   :  { %v1538_v38 = vpack.c.bf16 %v1244_v34, %v1243_v33  ;;  %v1146_v39 = vmax.f32 %v1082_v35, 0.0  ;;  %734 = vmatmul.bf16.gmra.mxu1 %v339_v26  ;;  %814 = vmatmul.bf16.gmra.mxu3 %v371_v31  ;;  %v1051_v41 = vadd.f32 %v1898_v63, %v696_v36  ;;  %v236_v33 = vld [vmem:[#allocation3 + $0x160] sm:$0xff]  ;;  %v238_v34 = vld [vmem:[#allocation3 + $0x170] sm:$0xff] }
  0xc1   :  { %v300_v35 = vld [vmem:[#allocation3 + $0x360] sm:$0xff] }
  0xc2   :  { %1539 = vst [vmem:[#allocation9] sm:$0xff] %v1538_v38   ;;  %v1211_v40 = vmul.f32 %v1901_v7, %v1146_v39  ;;  %v606_v42 = vpop.f32.mrf.mxu2  ;;  %v1115_v50 = vmax.f32 %v1051_v41, 0.0  ;;  %v302_v38 = vld [vmem:[#allocation3 + $0x370] sm:$0xff]  ;;  %v237_v39 = vld [vmem:[#allocation3 + $0x168] sm:$0xff] }
  0xc3   :  { %v775_v43 = vpop.f32.mrf.mxu3  ;;  %v301_v41 = vld [vmem:[#allocation3 + $0x368] sm:$0xff] }
  0xc4   :  { %v1276_v45 = vadd.f32 %v1906_v20, %v1211_v40  ;;  %v776_v46 = vadd.f32 %v775_v43, %v606_v42  ;;  %v528_v47 = vpop.f32.mrf.mxu0  ;;  %v1180_v62 = vmul.f32 %v1901_v7, %v1115_v50  ;;  %v239_v40 = vld [vmem:[#allocation3 + $0x178] sm:$0xff] }
  0xc5   :  { %v697_v48 = vpop.f32.mrf.mxu1  ;;  %v303_v42 = vld [vmem:[#allocation3 + $0x378] sm:$0xff] }
  0xc6   :  { %v1618_v49 = vpack.c.bf16 %v1276_v45, %v1275_v44  ;;  %v698_v51 = vadd.f32 %v697_v48, %v528_v47  ;;  %v1083_v55 = vadd.f32 %v1898_v63, %v776_v46  ;;  %v1245_v13 = vadd.f32 %v1906_v20, %v1180_v62 }
  0xc7   :  { %v342_v47 = vpack.c.bf16 %v238_v34, %v236_v33  ;;  %v374_v48 = vpack.c.bf16 %v302_v38, %v300_v35  ;;  %v375_v54 = vpack.c.bf16 %v303_v42, %v301_v41 }
  0xc8   :  { %1710 = vst [vmem:[#allocation9 + $0x80] sm:$0xff] %v1618_v49   ;;  %v1052_v56 = vadd.f32 %v1898_v63, %v698_v51  ;;  %v1147_v6 = vmax.f32 %v1083_v55, 0.0  ;;  %v343_v49 = vpack.c.bf16 %v239_v40, %v237_v39 }
  0xca   :  { %v1116_v0 = vmax.f32 %v1052_v56, 0.0  ;;  %v608_v1 = vpop.f32.mrf.mxu2  ;;  %v1212_v17 = vmul.f32 %v1901_v7, %v1147_v6 }
  0xcb   :  { %v777_v2 = vpop.f32.mrf.mxu3 }
  0xcc   :  { %v1181_v8 = vmul.f32 %v1901_v7, %v1116_v0  ;;  %v778_v9 = vadd.f32 %v777_v2, %v608_v1  ;;  %v531_v10 = vpop.f32.mrf.mxu0  ;;  %v1277_v25 = vadd.f32 %v1906_v20, %v1212_v17 }
  0xcd   :  { %v700_v12 = vpop.f32.mrf.mxu1 }
  0xce   :  { %v1246_v14 = vadd.f32 %v1906_v20, %v1181_v8  ;;  %v1084_v15 = vadd.f32 %v1898_v63, %v778_v9  ;;  %v701_v16 = vadd.f32 %v700_v12, %v531_v10 }
  0xcf   :  { %570 = vmatmul.bf16.gmra.mxu0 %v340_v3  ;;  %650 = vmatmul.bf16.gmra.mxu2 %v372_v4 }
  0xd0   :  { %v1543_v18 = vpack.c.bf16 %v1246_v14, %v1245_v13  ;;  %v1148_v19 = vmax.f32 %v1084_v15, 0.0  ;;  %739 = vmatmul.bf16.gmra.mxu1 %v341_v5  ;;  %819 = vmatmul.bf16.gmra.mxu3 %v373_v11  ;;  %v1053_v22 = vadd.f32 %v1898_v63, %v701_v16  ;;  %v240_v13 = vld [vmem:[#allocation3 + $0x180] sm:$0xff]  ;;  %v242_v14 = vld [vmem:[#allocation3 + $0x190] sm:$0xff] }
  0xd1   :  { %v304_v15 = vld [vmem:[#allocation3 + $0x380] sm:$0xff] }
  0xd2   :  { %1695 = vst [vmem:[#allocation9 + $0x8] sm:$0xff] %v1543_v18   ;;  %v1213_v21 = vmul.f32 %v1901_v7, %v1148_v19  ;;  %v611_v23 = vpop.f32.mrf.mxu2  ;;  %v1117_v31 = vmax.f32 %v1053_v22, 0.0  ;;  %v306_v18 = vld [vmem:[#allocation3 + $0x390] sm:$0xff]  ;;  %v241_v19 = vld [vmem:[#allocation3 + $0x188] sm:$0xff] }
  0xd3   :  { %v780_v24 = vpop.f32.mrf.mxu3  ;;  %v305_v22 = vld [vmem:[#allocation3 + $0x388] sm:$0xff] }
  0xd4   :  { %v1278_v26 = vadd.f32 %v1906_v20, %v1213_v21  ;;  %v781_v27 = vadd.f32 %v780_v24, %v611_v23  ;;  %v533_v28 = vpop.f32.mrf.mxu0  ;;  %v1182_v43 = vmul.f32 %v1901_v7, %v1117_v31  ;;  %v243_v21 = vld [vmem:[#allocation3 + $0x198] sm:$0xff] }
  0xd5   :  { %v702_v29 = vpop.f32.mrf.mxu1  ;;  %v307_v23 = vld [vmem:[#allocation3 + $0x398] sm:$0xff] }
  0xd6   :  { %v1623_v30 = vpack.c.bf16 %v1278_v26, %v1277_v25  ;;  %v703_v32 = vadd.f32 %v702_v29, %v533_v28  ;;  %v1085_v36 = vadd.f32 %v1898_v63, %v781_v27  ;;  %v1247_v56 = vadd.f32 %v1906_v20, %v1182_v43 }
  0xd7   :  { %v344_v28 = vpack.c.bf16 %v242_v14, %v240_v13  ;;  %v376_v29 = vpack.c.bf16 %v306_v18, %v304_v15  ;;  %v377_v35 = vpack.c.bf16 %v307_v23, %v305_v22 }
  0xd8   :  { %1711 = vst [vmem:[#allocation9 + $0x88] sm:$0xff] %v1623_v30   ;;  %v1054_v37 = vadd.f32 %v1898_v63, %v703_v32  ;;  %v1149_v50 = vmax.f32 %v1085_v36, 0.0  ;;  %v345_v30 = vpack.c.bf16 %v243_v21, %v241_v19 }
  0xda   :  { %v1118_v44 = vmax.f32 %v1054_v37, 0.0  ;;  %v613_v45 = vpop.f32.mrf.mxu2  ;;  %v1214_v60 = vmul.f32 %v1901_v7, %v1149_v50 }
  0xdb   :  { %v782_v46 = vpop.f32.mrf.mxu3 }
  0xdc   :  { %v1183_v51 = vmul.f32 %v1901_v7, %v1118_v44  ;;  %v783_v52 = vadd.f32 %v782_v46, %v613_v45  ;;  %v536_v53 = vpop.f32.mrf.mxu0  ;;  %v1279_v4 = vadd.f32 %v1906_v20, %v1214_v60 }
  0xdd   :  { %v705_v55 = vpop.f32.mrf.mxu1 }
  0xde   :  { %v1248_v57 = vadd.f32 %v1906_v20, %v1183_v51  ;;  %v1086_v58 = vadd.f32 %v1898_v63, %v783_v52  ;;  %v706_v59 = vadd.f32 %v705_v55, %v536_v53 }
  0xdf   :  { %575 = vmatmul.bf16.gmra.mxu0 %v342_v47  ;;  %655 = vmatmul.bf16.gmra.mxu2 %v374_v48 }
  0xe0   :  { %v1548_v61 = vpack.c.bf16 %v1248_v57, %v1247_v56  ;;  %v1150_v62 = vmax.f32 %v1086_v58, 0.0  ;;  %744 = vmatmul.bf16.gmra.mxu1 %v343_v49  ;;  %824 = vmatmul.bf16.gmra.mxu3 %v375_v54  ;;  %v1055_v1 = vadd.f32 %v1898_v63, %v706_v59  ;;  %v244_v56 = vld [vmem:[#allocation3 + $0x1a0] sm:$0xff]  ;;  %v246_v57 = vld [vmem:[#allocation3 + $0x1b0] sm:$0xff] }
  0xe1   :  { %v308_v58 = vld [vmem:[#allocation3 + $0x3a0] sm:$0xff] }
  0xe2   :  { %1696 = vst [vmem:[#allocation9 + $0x10] sm:$0xff] %v1548_v61   ;;  %v1215_v0 = vmul.f32 %v1901_v7, %v1150_v62  ;;  %v616_v2 = vpop.f32.mrf.mxu2  ;;  %v1119_v11 = vmax.f32 %v1055_v1, 0.0  ;;  %v310_v61 = vld [vmem:[#allocation3 + $0x3b0] sm:$0xff]  ;;  %v245_v62 = vld [vmem:[#allocation3 + $0x1a8] sm:$0xff] }
  0xe3   :  { %v785_v3 = vpop.f32.mrf.mxu3  ;;  %v309_v1 = vld [vmem:[#allocation3 + $0x3a8] sm:$0xff] }
  0xe4   :  { %v1280_v5 = vadd.f32 %v1906_v20, %v1215_v0  ;;  %v786_v6 = vadd.f32 %v785_v3, %v616_v2  ;;  %v538_v8 = vpop.f32.mrf.mxu0  ;;  %v1184_v24 = vmul.f32 %v1901_v7, %v1119_v11  ;;  %v247_v0 = vld [vmem:[#allocation3 + $0x1b8] sm:$0xff] }
  0xe5   :  { %v707_v9 = vpop.f32.mrf.mxu1  ;;  %v311_v2 = vld [vmem:[#allocation3 + $0x3b8] sm:$0xff] }
  0xe6   :  { %v1628_v10 = vpack.c.bf16 %v1280_v5, %v1279_v4  ;;  %v708_v12 = vadd.f32 %v707_v9, %v538_v8  ;;  %v1087_v16 = vadd.f32 %v1898_v63, %v786_v6  ;;  %v1249_v37 = vadd.f32 %v1906_v20, %v1184_v24 }
  0xe7   :  { %v346_v8 = vpack.c.bf16 %v246_v57, %v244_v56  ;;  %v378_v9 = vpack.c.bf16 %v310_v61, %v308_v58  ;;  %v379_v15 = vpack.c.bf16 %v311_v2, %v309_v1 }
  0xe8   :  { %1712 = vst [vmem:[#allocation9 + $0x90] sm:$0xff] %v1628_v10   ;;  %v1056_v17 = vadd.f32 %v1898_v63, %v708_v12  ;;  %v1151_v31 = vmax.f32 %v1087_v16, 0.0  ;;  %v347_v10 = vpack.c.bf16 %v247_v0, %v245_v62 }
  0xea   :  { %v1120_v25 = vmax.f32 %v1056_v17, 0.0  ;;  %v618_v26 = vpop.f32.mrf.mxu2  ;;  %v1216_v41 = vmul.f32 %v1901_v7, %v1151_v31 }
  0xeb   :  { %v787_v27 = vpop.f32.mrf.mxu3 }
  0xec   :  { %v1185_v32 = vmul.f32 %v1901_v7, %v1120_v25  ;;  %v788_v33 = vadd.f32 %v787_v27, %v618_v26  ;;  %v541_v34 = vpop.f32.mrf.mxu0  ;;  %v1281_v48 = vadd.f32 %v1906_v20, %v1216_v41 }
  0xed   :  { %v710_v36 = vpop.f32.mrf.mxu1 }
  0xee   :  { %v1250_v38 = vadd.f32 %v1906_v20, %v1185_v32  ;;  %v1088_v39 = vadd.f32 %v1898_v63, %v788_v33  ;;  %v711_v40 = vadd.f32 %v710_v36, %v541_v34 }
  0xef   :  { %580 = vmatmul.bf16.gmra.mxu0 %v344_v28  ;;  %660 = vmatmul.bf16.gmra.mxu2 %v376_v29 }
  0xf0   :  { %v1553_v42 = vpack.c.bf16 %v1250_v38, %v1249_v37  ;;  %v1152_v43 = vmax.f32 %v1088_v39, 0.0  ;;  %749 = vmatmul.bf16.gmra.mxu1 %v345_v30  ;;  %829 = vmatmul.bf16.gmra.mxu3 %v377_v35  ;;  %v1057_v45 = vadd.f32 %v1898_v63, %v711_v40  ;;  %v248_v37 = vld [vmem:[#allocation3 + $0x1c0] sm:$0xff]  ;;  %v250_v38 = vld [vmem:[#allocation3 + $0x1d0] sm:$0xff] }
  0xf1   :  { %v312_v39 = vld [vmem:[#allocation3 + $0x3c0] sm:$0xff] }
  0xf2   :  { %1697 = vst [vmem:[#allocation9 + $0x18] sm:$0xff] %v1553_v42   ;;  %v1217_v44 = vmul.f32 %v1901_v7, %v1152_v43  ;;  %v621_v46 = vpop.f32.mrf.mxu2  ;;  %v1121_v54 = vmax.f32 %v1057_v45, 0.0  ;;  %v314_v42 = vld [vmem:[#allocation3 + $0x3d0] sm:$0xff]  ;;  %v249_v43 = vld [vmem:[#allocation3 + $0x1c8] sm:$0xff] }
  0xf3   :  { %v790_v47 = vpop.f32.mrf.mxu3  ;;  %v313_v45 = vld [vmem:[#allocation3 + $0x3c8] sm:$0xff] }
  0xf4   :  { %v1282_v49 = vadd.f32 %v1906_v20, %v1217_v44  ;;  %v791_v50 = vadd.f32 %v790_v47, %v621_v46  ;;  %v543_v51 = vpop.f32.mrf.mxu0  ;;  %v1186_v3 = vmul.f32 %v1901_v7, %v1121_v54  ;;  %v251_v44 = vld [vmem:[#allocation3 + $0x1d8] sm:$0xff] }
  0xf5   :  { %v712_v52 = vpop.f32.mrf.mxu1  ;;  %v315_v46 = vld [vmem:[#allocation3 + $0x3d8] sm:$0xff] }
  0xf6   :  { %v1633_v53 = vpack.c.bf16 %v1282_v49, %v1281_v48  ;;  %v713_v55 = vadd.f32 %v712_v52, %v543_v51  ;;  %v1089_v59 = vadd.f32 %v1898_v63, %v791_v50  ;;  %v1251_v17 = vadd.f32 %v1906_v20, %v1186_v3 }
  0xf7   :  { %v348_v51 = vpack.c.bf16 %v250_v38, %v248_v37  ;;  %v380_v52 = vpack.c.bf16 %v314_v42, %v312_v39  ;;  %v381_v58 = vpack.c.bf16 %v315_v46, %v313_v45 }
  0xf8   :  { %1713 = vst [vmem:[#allocation9 + $0x98] sm:$0xff] %v1633_v53   ;;  %v1058_v60 = vadd.f32 %v1898_v63, %v713_v55  ;;  %v1153_v11 = vmax.f32 %v1089_v59, 0.0  ;;  %v349_v53 = vpack.c.bf16 %v251_v44, %v249_v43 }
  0xfa   :  { %v1122_v4 = vmax.f32 %v1058_v60, 0.0  ;;  %v623_v5 = vpop.f32.mrf.mxu2  ;;  %v1218_v22 = vmul.f32 %v1901_v7, %v1153_v11 }
  0xfb   :  { %v792_v6 = vpop.f32.mrf.mxu3 }
  0xfc   :  { %v1187_v12 = vmul.f32 %v1901_v7, %v1122_v4  ;;  %v793_v13 = vadd.f32 %v792_v6, %v623_v5  ;;  %v546_v14 = vpop.f32.mrf.mxu0  ;;  %v1283_v29 = vadd.f32 %v1906_v20, %v1218_v22 }
  0xfd   :  { %v715_v16 = vpop.f32.mrf.mxu1 }
  0xfe   :  { %v1252_v18 = vadd.f32 %v1906_v20, %v1187_v12  ;;  %v1090_v19 = vadd.f32 %v1898_v63, %v793_v13  ;;  %v716_v21 = vadd.f32 %v715_v16, %v546_v14 }
  0xff   :  { %585 = vmatmul.bf16.gmra.mxu0 %v346_v8  ;;  %665 = vmatmul.bf16.gmra.mxu2 %v378_v9 }
 0x100   :  { %v1558_v23 = vpack.c.bf16 %v1252_v18, %v1251_v17  ;;  %v1154_v24 = vmax.f32 %v1090_v19, 0.0  ;;  %754 = vmatmul.bf16.gmra.mxu1 %v347_v10  ;;  %834 = vmatmul.bf16.gmra.mxu3 %v379_v15  ;;  %v1059_v26 = vadd.f32 %v1898_v63, %v716_v21  ;;  %v252_v17 = vld [vmem:[#allocation3 + $0x1e0] sm:$0xff]  ;;  %v254_v18 = vld [vmem:[#allocation3 + $0x1f0] sm:$0xff] }
 0x101   :  { %v316_v19 = vld [vmem:[#allocation3 + $0x3e0] sm:$0xff] }
 0x102   :  { %1698 = vst [vmem:[#allocation9 + $0x20] sm:$0xff] %v1558_v23   ;;  %v1219_v25 = vmul.f32 %v1901_v7, %v1154_v24  ;;  %v626_v27 = vpop.f32.mrf.mxu2  ;;  %v1123_v35 = vmax.f32 %v1059_v26, 0.0  ;;  %v318_v23 = vld [vmem:[#allocation3 + $0x3f0] sm:$0xff]  ;;  %v253_v24 = vld [vmem:[#allocation3 + $0x1e8] sm:$0xff] }
 0x103   :  { %v795_v28 = vpop.f32.mrf.mxu3  ;;  %v317_v26 = vld [vmem:[#allocation3 + $0x3e8] sm:$0xff] }
 0x104   :  { %v1284_v30 = vadd.f32 %v1906_v20, %v1219_v25  ;;  %v796_v31 = vadd.f32 %v795_v28, %v626_v27  ;;  %v548_v32 = vpop.f32.mrf.mxu0  ;;  %v1188_v47 = vmul.f32 %v1901_v7, %v1123_v35  ;;  %v255_v25 = vld [vmem:[#allocation3 + $0x1f8] sm:$0xff] }
 0x105   :  { %v717_v33 = vpop.f32.mrf.mxu1  ;;  %v319_v27 = vld [vmem:[#allocation3 + $0x3f8] sm:$0xff] }
 0x106   :  { %v1638_v34 = vpack.c.bf16 %v1284_v30, %v1283_v29  ;;  %v718_v36 = vadd.f32 %v717_v33, %v548_v32  ;;  %v1091_v40 = vadd.f32 %v1898_v63, %v796_v31  ;;  %v1253_v60 = vadd.f32 %v1906_v20, %v1188_v47 }
 0x107   :  { %v350_v32 = vpack.c.bf16 %v254_v18, %v252_v17  ;;  %v382_v33 = vpack.c.bf16 %v318_v23, %v316_v19  ;;  %v383_v39 = vpack.c.bf16 %v319_v27, %v317_v26 }
 0x108   :  { %1714 = vst [vmem:[#allocation9 + $0xa0] sm:$0xff] %v1638_v34   ;;  %v1060_v41 = vadd.f32 %v1898_v63, %v718_v36  ;;  %v1155_v54 = vmax.f32 %v1091_v40, 0.0  ;;  %v351_v34 = vpack.c.bf16 %v255_v25, %v253_v24 }
 0x10a   :  { %v1124_v48 = vmax.f32 %v1060_v41, 0.0  ;;  %v628_v49 = vpop.f32.mrf.mxu2  ;;  %v1220_v1 = vmul.f32 %v1901_v7, %v1155_v54 }
 0x10b   :  { %v797_v50 = vpop.f32.mrf.mxu3 }
 0x10c   :  { %v1189_v55 = vmul.f32 %v1901_v7, %v1124_v48  ;;  %v798_v56 = vadd.f32 %v797_v50, %v628_v49  ;;  %v551_v57 = vpop.f32.mrf.mxu0  ;;  %v1285_v9 = vadd.f32 %v1906_v20, %v1220_v1 }
 0x10d   :  { %v720_v59 = vpop.f32.mrf.mxu1 }
 0x10e   :  { %v1254_v61 = vadd.f32 %v1906_v20, %v1189_v55  ;;  %v1092_v62 = vadd.f32 %v1898_v63, %v798_v56  ;;  %v721_v0 = vadd.f32 %v720_v59, %v551_v57 }
 0x10f   :  { %590 = vmatmul.bf16.gmra.mxu0 %v348_v51  ;;  %670 = vmatmul.bf16.gmra.mxu2 %v380_v52 }
 0x110   :  { %v1563_v2 = vpack.c.bf16 %v1254_v61, %v1253_v60  ;;  %v1156_v3 = vmax.f32 %v1092_v62, 0.0  ;;  %759 = vmatmul.bf16.gmra.mxu1 %v349_v53  ;;  %839 = vmatmul.bf16.gmra.mxu3 %v381_v58  ;;  %v1061_v5 = vadd.f32 %v1898_v63, %v721_v0 }
 0x112   :  { %1699 = vst [vmem:[#allocation9 + $0x28] sm:$0xff] %v1563_v2   ;;  %v1221_v4 = vmul.f32 %v1901_v7, %v1156_v3  ;;  %v631_v6 = vpop.f32.mrf.mxu2  ;;  %v1125_v15 = vmax.f32 %v1061_v5, 0.0 }
 0x113   :  { %v800_v8 = vpop.f32.mrf.mxu3 }
 0x114   :  { %v1286_v10 = vadd.f32 %v1906_v20, %v1221_v4  ;;  %v801_v11 = vadd.f32 %v800_v8, %v631_v6  ;;  %v553_v12 = vpop.f32.mrf.mxu0  ;;  %v1190_v28 = vmul.f32 %v1901_v7, %v1125_v15 }
 0x115   :  { %v722_v13 = vpop.f32.mrf.mxu1 }
 0x116   :  { %v1643_v14 = vpack.c.bf16 %v1286_v10, %v1285_v9  ;;  %v723_v16 = vadd.f32 %v722_v13, %v553_v12  ;;  %v1093_v21 = vadd.f32 %v1898_v63, %v801_v11  ;;  %v1255_v41 = vadd.f32 %v1906_v20, %v1190_v28 }
 0x118   :  { %1715 = vst [vmem:[#allocation9 + $0xa8] sm:$0xff] %v1643_v14   ;;  %v1062_v22 = vadd.f32 %v1898_v63, %v723_v16  ;;  %v1157_v35 = vmax.f32 %v1093_v21, 0.0 }
 0x11a   :  { %v1126_v29 = vmax.f32 %v1062_v22, 0.0  ;;  %v633_v30 = vpop.f32.mrf.mxu2  ;;  %v1222_v45 = vmul.f32 %v1901_v7, %v1157_v35 }
 0x11b   :  { %v802_v31 = vpop.f32.mrf.mxu3 }
 0x11c   :  { %v1191_v36 = vmul.f32 %v1901_v7, %v1126_v29  ;;  %v803_v37 = vadd.f32 %v802_v31, %v633_v30  ;;  %v556_v38 = vpop.f32.mrf.mxu0  ;;  %v1287_v52 = vadd.f32 %v1906_v20, %v1222_v45 }
 0x11d   :  { %v725_v40 = vpop.f32.mrf.mxu1 }
 0x11e   :  { %v1256_v42 = vadd.f32 %v1906_v20, %v1191_v36  ;;  %v1094_v43 = vadd.f32 %v1898_v63, %v803_v37  ;;  %v726_v44 = vadd.f32 %v725_v40, %v556_v38 }
 0x11f   :  { %595 = vmatmul.bf16.gmra.mxu0 %v350_v32  ;;  %675 = vmatmul.bf16.gmra.mxu2 %v382_v33 }
 0x120   :  { %v1568_v46 = vpack.c.bf16 %v1256_v42, %v1255_v41  ;;  %v1158_v47 = vmax.f32 %v1094_v43, 0.0  ;;  %764 = vmatmul.bf16.gmra.mxu1 %v351_v34  ;;  %844 = vmatmul.bf16.gmra.mxu3 %v383_v39  ;;  %v1063_v49 = vadd.f32 %v1898_v63, %v726_v44 }
 0x122   :  { %1700 = vst [vmem:[#allocation9 + $0x30] sm:$0xff] %v1568_v46   ;;  %v1223_v48 = vmul.f32 %v1901_v7, %v1158_v47  ;;  %v636_v50 = vpop.f32.mrf.mxu2  ;;  %v1127_v58 = vmax.f32 %v1063_v49, 0.0 }
 0x123   :  { %v805_v51 = vpop.f32.mrf.mxu3 }
 0x124   :  { %v1288_v53 = vadd.f32 %v1906_v20, %v1223_v48  ;;  %v806_v54 = vadd.f32 %v805_v51, %v636_v50  ;;  %v558_v55 = vpop.f32.mrf.mxu0  ;;  %v1192_v62 = vmul.f32 %v1901_v7, %v1127_v58 }
 0x125   :  { %v727_v56 = vpop.f32.mrf.mxu1 }
 0x126   :  { %v1648_v57 = vpack.c.bf16 %v1288_v53, %v1287_v52  ;;  %v728_v59 = vadd.f32 %v727_v56, %v558_v55  ;;  %v1095_v60 = vadd.f32 %v1898_v63, %v806_v54  ;;  %v1257_v9 = vadd.f32 %v1906_v20, %v1192_v62 }
 0x128   :  { %1716 = vst [vmem:[#allocation9 + $0xb0] sm:$0xff] %v1648_v57   ;;  %v1064_v61 = vadd.f32 %v1898_v63, %v728_v59  ;;  %v1159_v3 = vmax.f32 %v1095_v60, 0.0 }
 0x12a   :  { %v1128_v0 = vmax.f32 %v1064_v61, 0.0  ;;  %v638_v1 = vpop.f32.mrf.mxu2  ;;  %v1224_v13 = vmul.f32 %v1901_v7, %v1159_v3 }
 0x12b   :  { %v807_v2 = vpop.f32.mrf.mxu3 }
 0x12c   :  { %v1193_v4 = vmul.f32 %v1901_v7, %v1128_v0  ;;  %v808_v5 = vadd.f32 %v807_v2, %v638_v1  ;;  %v561_v6 = vpop.f32.mrf.mxu0  ;;  %v1289_v21 = vadd.f32 %v1906_v20, %v1224_v13 }
 0x12d   :  { %v730_v8 = vpop.f32.mrf.mxu1 }
 0x12e   :  { %v1258_v10 = vadd.f32 %v1906_v20, %v1193_v4  ;;  %v1096_v11 = vadd.f32 %v1898_v63, %v808_v5  ;;  %v731_v12 = vadd.f32 %v730_v8, %v561_v6 }
 0x130   :  { %v1573_v14 = vpack.c.bf16 %v1258_v10, %v1257_v9  ;;  %v1160_v15 = vmax.f32 %v1096_v11, 0.0  ;;  %v1065_v17 = vadd.f32 %v1898_v63, %v731_v12 }
 0x132   :  { %1701 = vst [vmem:[#allocation9 + $0x38] sm:$0xff] %v1573_v14   ;;  %v1225_v16 = vmul.f32 %v1901_v7, %v1160_v15  ;;  %v641_v18 = vpop.f32.mrf.mxu2  ;;  %v1129_v27 = vmax.f32 %v1065_v17, 0.0 }
 0x133   :  { %v810_v19 = vpop.f32.mrf.mxu3 }
 0x134   :  { %v1290_v22 = vadd.f32 %v1906_v20, %v1225_v16  ;;  %v811_v23 = vadd.f32 %v810_v19, %v641_v18  ;;  %v563_v24 = vpop.f32.mrf.mxu0  ;;  %v1194_v31 = vmul.f32 %v1901_v7, %v1129_v27 }
 0x135   :  { %v732_v25 = vpop.f32.mrf.mxu1 }
 0x136   :  { %v1653_v26 = vpack.c.bf16 %v1290_v22, %v1289_v21  ;;  %v733_v28 = vadd.f32 %v732_v25, %v563_v24  ;;  %v1097_v29 = vadd.f32 %v1898_v63, %v811_v23  ;;  %v1259_v40 = vadd.f32 %v1906_v20, %v1194_v31 }
 0x138   :  { %1717 = vst [vmem:[#allocation9 + $0xb8] sm:$0xff] %v1653_v26   ;;  %v1066_v30 = vadd.f32 %v1898_v63, %v733_v28  ;;  %v1161_v35 = vmax.f32 %v1097_v29, 0.0 }
 0x13a   :  { %v1130_v32 = vmax.f32 %v1066_v30, 0.0  ;;  %v643_v33 = vpop.f32.mrf.mxu2  ;;  %v1226_v44 = vmul.f32 %v1901_v7, %v1161_v35 }
 0x13b   :  { %v812_v34 = vpop.f32.mrf.mxu3 }
 0x13c   :  { %v1195_v36 = vmul.f32 %v1901_v7, %v1130_v32  ;;  %v813_v37 = vadd.f32 %v812_v34, %v643_v33  ;;  %v566_v38 = vpop.f32.mrf.mxu0  ;;  %v1291_v51 = vadd.f32 %v1906_v20, %v1226_v44 }
 0x13d   :  { %v735_v39 = vpop.f32.mrf.mxu1 }
 0x13e   :  { %v1260_v41 = vadd.f32 %v1906_v20, %v1195_v36  ;;  %v1098_v42 = vadd.f32 %v1898_v63, %v813_v37  ;;  %v736_v43 = vadd.f32 %v735_v39, %v566_v38 }
 0x140   :  { %v1578_v45 = vpack.c.bf16 %v1260_v41, %v1259_v40  ;;  %v1162_v46 = vmax.f32 %v1098_v42, 0.0  ;;  %v1067_v48 = vadd.f32 %v1898_v63, %v736_v43 }
 0x142   :  { %1702 = vst [vmem:[#allocation9 + $0x40] sm:$0xff] %v1578_v45   ;;  %v1227_v47 = vmul.f32 %v1901_v7, %v1162_v46  ;;  %v646_v49 = vpop.f32.mrf.mxu2  ;;  %v1131_v57 = vmax.f32 %v1067_v48, 0.0 }
 0x143   :  { %v815_v50 = vpop.f32.mrf.mxu3 }
 0x144   :  { %v1292_v52 = vadd.f32 %v1906_v20, %v1227_v47  ;;  %v816_v53 = vadd.f32 %v815_v50, %v646_v49  ;;  %v568_v54 = vpop.f32.mrf.mxu0  ;;  %v1196_v61 = vmul.f32 %v1901_v7, %v1131_v57 }
 0x145   :  { %v737_v55 = vpop.f32.mrf.mxu1 }
 0x146   :  { %v1658_v56 = vpack.c.bf16 %v1292_v52, %v1291_v51  ;;  %v738_v58 = vadd.f32 %v737_v55, %v568_v54  ;;  %v1099_v59 = vadd.f32 %v1898_v63, %v816_v53  ;;  %v1261_v8 = vadd.f32 %v1906_v20, %v1196_v61 }
 0x148   :  { %1718 = vst [vmem:[#allocation9 + $0xc0] sm:$0xff] %v1658_v56   ;;  %v1068_v60 = vadd.f32 %v1898_v63, %v738_v58  ;;  %v1163_v2 = vmax.f32 %v1099_v59, 0.0 }
 0x14a   :  { %v1132_v62 = vmax.f32 %v1068_v60, 0.0  ;;  %v648_v0 = vpop.f32.mrf.mxu2  ;;  %v1228_v12 = vmul.f32 %v1901_v7, %v1163_v2 }
 0x14b   :  { %v817_v1 = vpop.f32.mrf.mxu3 }
 0x14c   :  { %v1197_v3 = vmul.f32 %v1901_v7, %v1132_v62  ;;  %v818_v4 = vadd.f32 %v817_v1, %v648_v0  ;;  %v571_v5 = vpop.f32.mrf.mxu0  ;;  %v1293_v19 = vadd.f32 %v1906_v20, %v1228_v12 }
 0x14d   :  { %v740_v6 = vpop.f32.mrf.mxu1 }
 0x14e   :  { %v1262_v9 = vadd.f32 %v1906_v20, %v1197_v3  ;;  %v1100_v10 = vadd.f32 %v1898_v63, %v818_v4  ;;  %v741_v11 = vadd.f32 %v740_v6, %v571_v5 }
 0x150   :  { %v1583_v13 = vpack.c.bf16 %v1262_v9, %v1261_v8  ;;  %v1164_v14 = vmax.f32 %v1100_v10, 0.0  ;;  %v1069_v16 = vadd.f32 %v1898_v63, %v741_v11 }
 0x152   :  { %1703 = vst [vmem:[#allocation9 + $0x48] sm:$0xff] %v1583_v13   ;;  %v1229_v15 = vmul.f32 %v1901_v7, %v1164_v14  ;;  %v651_v17 = vpop.f32.mrf.mxu2  ;;  %v1133_v26 = vmax.f32 %v1069_v16, 0.0 }
 0x153   :  { %v820_v18 = vpop.f32.mrf.mxu3 }
 0x154   :  { %v1294_v21 = vadd.f32 %v1906_v20, %v1229_v15  ;;  %v821_v22 = vadd.f32 %v820_v18, %v651_v17  ;;  %v573_v23 = vpop.f32.mrf.mxu0  ;;  %v1198_v30 = vmul.f32 %v1901_v7, %v1133_v26 }
 0x155   :  { %v742_v24 = vpop.f32.mrf.mxu1 }
 0x156   :  { %v1663_v25 = vpack.c.bf16 %v1294_v21, %v1293_v19  ;;  %v743_v27 = vadd.f32 %v742_v24, %v573_v23  ;;  %v1101_v28 = vadd.f32 %v1898_v63, %v821_v22  ;;  %v1263_v39 = vadd.f32 %v1906_v20, %v1198_v30 }
 0x158   :  { %1719 = vst [vmem:[#allocation9 + $0xc8] sm:$0xff] %v1663_v25   ;;  %v1070_v29 = vadd.f32 %v1898_v63, %v743_v27  ;;  %v1165_v34 = vmax.f32 %v1101_v28, 0.0  ;;  %v2050_v28 = vld [vmem:[#allocation8] ss:$0 sm:$0xff] }
 0x15a   :  { %v1134_v31 = vmax.f32 %v1070_v29, 0.0  ;;  %v653_v32 = vpop.f32.mrf.mxu2  ;;  %v1230_v43 = vmul.f32 %v1901_v7, %v1165_v34 }
 0x15b   :  { %v822_v33 = vpop.f32.mrf.mxu3 }
 0x15c   :  { %v1199_v35 = vmul.f32 %v1901_v7, %v1134_v31  ;;  %v823_v36 = vadd.f32 %v822_v33, %v653_v32  ;;  %v576_v37 = vpop.f32.mrf.mxu0  ;;  %v1295_v50 = vadd.f32 %v1906_v20, %v1230_v43 }
 0x15d   :  { %v745_v38 = vpop.f32.mrf.mxu1 }
 0x15e   :  { %v1264_v40 = vadd.f32 %v1906_v20, %v1199_v35  ;;  %v1102_v41 = vadd.f32 %v1898_v63, %v823_v36  ;;  %v746_v42 = vadd.f32 %v745_v38, %v576_v37 }
 0x160   :  { %v1588_v44 = vpack.c.bf16 %v1264_v40, %v1263_v39  ;;  %v1166_v45 = vmax.f32 %v1102_v41, 0.0  ;;  %v1071_v47 = vadd.f32 %v1898_v63, %v746_v42  ;;  %v2058_v42 = vld [vmem:[#allocation8 + $0x1] ss:$0 sm:$0xff] }
 0x162   :  { %1704 = vst [vmem:[#allocation9 + $0x50] sm:$0xff] %v1588_v44   ;;  %v1231_v46 = vmul.f32 %v1901_v7, %v1166_v45  ;;  %v656_v48 = vpop.f32.mrf.mxu2  ;;  %v1135_v56 = vmax.f32 %v1071_v47, 0.0 }
 0x163   :  { %v825_v49 = vpop.f32.mrf.mxu3 }
 0x164   :  { %v1296_v51 = vadd.f32 %v1906_v20, %v1231_v46  ;;  %v826_v52 = vadd.f32 %v825_v49, %v656_v48  ;;  %v578_v53 = vpop.f32.mrf.mxu0  ;;  %v1200_v60 = vmul.f32 %v1901_v7, %v1135_v56 }
 0x165   :  { %v747_v54 = vpop.f32.mrf.mxu1 }
 0x166   :  { %v1668_v55 = vpack.c.bf16 %v1296_v51, %v1295_v50  ;;  %v748_v57 = vadd.f32 %v747_v54, %v578_v53  ;;  %v1103_v58 = vadd.f32 %v1898_v63, %v826_v52  ;;  %v1265_v6 = vadd.f32 %v1906_v20, %v1200_v60 }
 0x168   :  { %1720 = vst [vmem:[#allocation9 + $0xd0] sm:$0xff] %v1668_v55   ;;  %v1072_v59 = vadd.f32 %v1898_v63, %v748_v57  ;;  %v1167_v1 = vmax.f32 %v1103_v58, 0.0 }
 0x16a   :  { %v1136_v61 = vmax.f32 %v1072_v59, 0.0  ;;  %v658_v62 = vpop.f32.mrf.mxu2  ;;  %v1232_v11 = vmul.f32 %v1901_v7, %v1167_v1 }
 0x16b   :  { %v827_v0 = vpop.f32.mrf.mxu3 }
 0x16c   :  { %v1201_v2 = vmul.f32 %v1901_v7, %v1136_v61  ;;  %v828_v3 = vadd.f32 %v827_v0, %v658_v62  ;;  %v581_v4 = vpop.f32.mrf.mxu0  ;;  %v1297_v18 = vadd.f32 %v1906_v20, %v1232_v11 }
 0x16d   :  { %v750_v5 = vpop.f32.mrf.mxu1 }
 0x16e   :  { %v1266_v8 = vadd.f32 %v1906_v20, %v1201_v2  ;;  %v1104_v9 = vadd.f32 %v1898_v63, %v828_v3  ;;  %v751_v10 = vadd.f32 %v750_v5, %v581_v4  ;;  %v2069_v4 = vld [vmem:[#allocation8 + $0x2] ss:$0 sm:$0xff] }
 0x170   :  { %v1593_v12 = vpack.c.bf16 %v1266_v8, %v1265_v6  ;;  %v1168_v13 = vmax.f32 %v1104_v9, 0.0  ;;  %v1073_v15 = vadd.f32 %v1898_v63, %v751_v10 }
 0x172   :  { %1705 = vst [vmem:[#allocation9 + $0x58] sm:$0xff] %v1593_v12   ;;  %v1233_v14 = vmul.f32 %v1901_v7, %v1168_v13  ;;  %v661_v16 = vpop.f32.mrf.mxu2  ;;  %v1137_v25 = vmax.f32 %v1073_v15, 0.0 }
 0x173   :  { %v830_v17 = vpop.f32.mrf.mxu3 }
 0x174   :  { %v1298_v19 = vadd.f32 %v1906_v20, %v1233_v14  ;;  %v831_v21 = vadd.f32 %v830_v17, %v661_v16  ;;  %v583_v22 = vpop.f32.mrf.mxu0  ;;  %v1202_v30 = vmul.f32 %v1901_v7, %v1137_v25 }
 0x175   :  { %v752_v23 = vpop.f32.mrf.mxu1 }
 0x176   :  { %v1673_v24 = vpack.c.bf16 %v1298_v19, %v1297_v18  ;;  %v753_v26 = vadd.f32 %v752_v23, %v583_v22  ;;  %v1105_v27 = vadd.f32 %v1898_v63, %v831_v21  ;;  %v1267_v39 = vadd.f32 %v1906_v20, %v1202_v30 }
 0x178   :  { %1721 = vst [vmem:[#allocation9 + $0xd8] sm:$0xff] %v1673_v24   ;;  %v1074_v29 = vadd.f32 %v2050_v28, %v753_v26  ;;  %v1169_v34 = vmax.f32 %v1105_v27, 0.0 }
 0x17a   :  { %v1138_v31 = vmax.f32 %v1074_v29, 0.0  ;;  %v663_v32 = vpop.f32.mrf.mxu2  ;;  %v1234_v43 = vmul.f32 %v2058_v42, %v1169_v34 }
 0x17b   :  { %v832_v33 = vpop.f32.mrf.mxu3 }
 0x17c   :  { %v1203_v35 = vmul.f32 %v1901_v7, %v1138_v31  ;;  %v833_v36 = vadd.f32 %v832_v33, %v663_v32  ;;  %v586_v37 = vpop.f32.mrf.mxu0  ;;  %v1299_v49 = vadd.f32 %v1906_v20, %v1234_v43 }
 0x17d   :  { %v755_v38 = vpop.f32.mrf.mxu1 }
 0x17e   :  { %v1268_v40 = vadd.f32 %v1906_v20, %v1203_v35  ;;  %v1106_v63 = vadd.f32 %v2050_v28, %v833_v36  ;;  %v756_v41 = vadd.f32 %v755_v38, %v586_v37 }
 0x180   :  { %v1598_v44 = vpack.c.bf16 %v1268_v40, %v1267_v39  ;;  %v1170_v45 = vmax.f32 %v1106_v63, 0.0  ;;  %v1075_v7 = vadd.f32 %v2050_v28, %v756_v41 }
 0x182   :  { %1706 = vst [vmem:[#allocation9 + $0x60] sm:$0xff] %v1598_v44   ;;  %v1235_v46 = vmul.f32 %v2058_v42, %v1170_v45  ;;  %v666_v47 = vpop.f32.mrf.mxu2  ;;  %v1139_v55 = vmax.f32 %v1075_v7, 0.0 }
 0x183   :  { %v835_v48 = vpop.f32.mrf.mxu3 }
 0x184   :  { %v1300_v50 = vadd.f32 %v1906_v20, %v1235_v46  ;;  %v836_v51 = vadd.f32 %v835_v48, %v666_v47  ;;  %v588_v52 = vpop.f32.mrf.mxu0  ;;  %v1204_v59 = vmul.f32 %v2058_v42, %v1139_v55 }
 0x185   :  { %v757_v53 = vpop.f32.mrf.mxu1 }
 0x186   :  { %v1678_v54 = vpack.c.bf16 %v1300_v50, %v1299_v49  ;;  %v758_v56 = vadd.f32 %v757_v53, %v588_v52  ;;  %v1107_v57 = vadd.f32 %v2050_v28, %v836_v51  ;;  %v1269_v5 = vadd.f32 %v2069_v4, %v1204_v59 }
 0x188   :  { %1722 = vst [vmem:[#allocation9 + $0xe0] sm:$0xff] %v1678_v54   ;;  %v1076_v58 = vadd.f32 %v2050_v28, %v758_v56  ;;  %v1171_v0 = vmax.f32 %v1107_v57, 0.0 }
 0x18a   :  { %v1140_v60 = vmax.f32 %v1076_v58, 0.0  ;;  %v668_v61 = vpop.f32.mrf.mxu2  ;;  %v1236_v10 = vmul.f32 %v2058_v42, %v1171_v0 }
 0x18b   :  { %v837_v62 = vpop.f32.mrf.mxu3 }
 0x18c   :  { %v1205_v1 = vmul.f32 %v2058_v42, %v1140_v60  ;;  %v838_v20 = vadd.f32 %v837_v62, %v668_v61  ;;  %v591_v2 = vpop.f32.mrf.mxu0  ;;  %v1301_v17 = vadd.f32 %v2069_v4, %v1236_v10 }
 0x18d   :  { %v760_v3 = vpop.f32.mrf.mxu1 }
 0x18e   :  { %v1270_v6 = vadd.f32 %v2069_v4, %v1205_v1  ;;  %v1108_v8 = vadd.f32 %v2050_v28, %v838_v20  ;;  %v761_v9 = vadd.f32 %v760_v3, %v591_v2 }
 0x190   :  { %v1603_v11 = vpack.c.bf16 %v1270_v6, %v1269_v5  ;;  %v1172_v12 = vmax.f32 %v1108_v8, 0.0  ;;  %v1077_v14 = vadd.f32 %v2050_v28, %v761_v9 }
 0x192   :  { %1707 = vst [vmem:[#allocation9 + $0x68] sm:$0xff] %v1603_v11   ;;  %v1237_v13 = vmul.f32 %v2058_v42, %v1172_v12  ;;  %v671_v15 = vpop.f32.mrf.mxu2  ;;  %v1141_v24 = vmax.f32 %v1077_v14, 0.0 }
 0x193   :  { %v840_v16 = vpop.f32.mrf.mxu3 }
 0x194   :  { %v1302_v18 = vadd.f32 %v2069_v4, %v1237_v13  ;;  %v841_v19 = vadd.f32 %v840_v16, %v671_v15  ;;  %v593_v21 = vpop.f32.mrf.mxu0  ;;  %v1206_v29 = vmul.f32 %v2058_v42, %v1141_v24 }
 0x195   :  { %v762_v22 = vpop.f32.mrf.mxu1 }
 0x196   :  { %v1683_v23 = vpack.c.bf16 %v1302_v18, %v1301_v17  ;;  %v763_v25 = vadd.f32 %v762_v22, %v593_v21  ;;  %v1109_v26 = vadd.f32 %v2050_v28, %v841_v19  ;;  %v1271_v38 = vadd.f32 %v2069_v4, %v1206_v29 }
 0x198   :  { %1723 = vst [vmem:[#allocation9 + $0xe8] sm:$0xff] %v1683_v23   ;;  %v1078_v27 = vadd.f32 %v2050_v28, %v763_v25  ;;  %v1173_v33 = vmax.f32 %v1109_v26, 0.0 }
 0x19a   :  { %v1142_v30 = vmax.f32 %v1078_v27, 0.0  ;;  %v673_v31 = vpop.f32.mrf.mxu2  ;;  %v1238_v41 = vmul.f32 %v2058_v42, %v1173_v33 }
 0x19b   :  { %v842_v32 = vpop.f32.mrf.mxu3 }
 0x19c   :  { %v1207_v34 = vmul.f32 %v2058_v42, %v1142_v30  ;;  %v843_v35 = vadd.f32 %v842_v32, %v673_v31  ;;  %v596_v36 = vpop.f32.mrf.mxu0  ;;  %v1303_v48 = vadd.f32 %v2069_v4, %v1238_v41 }
 0x19d   :  { %v765_v37 = vpop.f32.mrf.mxu1 }
 0x19e   :  { %v1272_v39 = vadd.f32 %v2069_v4, %v1207_v34  ;;  %v1110_v40 = vadd.f32 %v2050_v28, %v843_v35  ;;  %v766_v63 = vadd.f32 %v765_v37, %v596_v36 }
 0x1a0   :  { %v1608_v43 = vpack.c.bf16 %v1272_v39, %v1271_v38  ;;  %v1174_v44 = vmax.f32 %v1110_v40, 0.0  ;;  %v1079_v46 = vadd.f32 %v2050_v28, %v766_v63 }
 0x1a2   :  { %1708 = vst [vmem:[#allocation9 + $0x70] sm:$0xff] %v1608_v43   ;;  %v1239_v45 = vmul.f32 %v2058_v42, %v1174_v44  ;;  %v676_v7 = vpop.f32.mrf.mxu2  ;;  %v1143_v54 = vmax.f32 %v1079_v46, 0.0 }
 0x1a3   :  { %v845_v47 = vpop.f32.mrf.mxu3 }
 0x1a4   :  { %v1304_v49 = vadd.f32 %v2069_v4, %v1239_v45  ;;  %v846_v50 = vadd.f32 %v845_v47, %v676_v7  ;;  %v598_v51 = vpop.f32.mrf.mxu0  ;;  %v1208_v58 = vmul.f32 %v2058_v42, %v1143_v54 }
 0x1a5   :  { %v767_v52 = vpop.f32.mrf.mxu1 }
 0x1a6   :  { %v1688_v53 = vpack.c.bf16 %v1304_v49, %v1303_v48  ;;  %v768_v55 = vadd.f32 %v767_v52, %v598_v51  ;;  %v1111_v56 = vadd.f32 %v2050_v28, %v846_v50  ;;  %v1273_v20 = vadd.f32 %v2069_v4, %v1208_v58 }
 0x1a8   :  { %1724 = vst [vmem:[#allocation9 + $0xf0] sm:$0xff] %v1688_v53   ;;  %v1080_v57 = vadd.f32 %v2050_v28, %v768_v55  ;;  %v1175_v62 = vmax.f32 %v1111_v56, 0.0 }
 0x1aa   :  { %v1144_v59 = vmax.f32 %v1080_v57, 0.0  ;;  %v678_v60 = vpop.f32.mrf.mxu2  ;;  %v1240_v5 = vmul.f32 %v2058_v42, %v1175_v62 }
 0x1ab   :  { %v847_v61 = vpop.f32.mrf.mxu3 }
 0x1ac   :  { %v1209_v0 = vmul.f32 %v2058_v42, %v1144_v59  ;;  %v848_v1 = vadd.f32 %v847_v61, %v678_v60  ;;  %v1305_v10 = vadd.f32 %v2069_v4, %v1240_v5 }
 0x1ae   :  { %v1274_v2 = vadd.f32 %v2069_v4, %v1209_v0  ;;  %v1112_v3 = vadd.f32 %v2050_v28, %v848_v1 }
 0x1b0   :  { %v1613_v6 = vpack.c.bf16 %v1274_v2, %v1273_v20  ;;  %v1176_v8 = vmax.f32 %v1112_v3, 0.0 }
 0x1b2   :  { %1709 = vst [vmem:[#allocation9 + $0x78] sm:$0xff] %v1613_v6   ;;  %v1241_v9 = vmul.f32 %v2058_v42, %v1176_v8 }
 0x1b4   :  { %v1306_v11 = vadd.f32 %v2069_v4, %v1241_v9 }
 0x1b6   :  { %v1693_v12 = vpack.c.bf16 %v1306_v11, %v1305_v10 }
 0x1b8   :  { %1725 = vst [vmem:[#allocation9 + $0xf8] sm:$0xff] %v1693_v12  }
 0x1b9   :  { %1447 = dma.vmem_to_hbm [thread:$0]  %s1440_s29, 4096, %s1442_s5, [#allocation5], %s1859_s20, %s1859_s20, %s1860_s21  }
 0x1ba   :  { %1856 = dma.done.wait [#allocation5], 4096  }
 0x1bb   :  { %1857 = vsyncadd [#allocation5], 4294963200 }
 0x1bc   :  { %1452 = vsyncpa [#allocation4], 1 }
 0x1bd   :  { %1453 = vsyncpa [#allocation7], 1 }
 0x1be   :  { %1454 = vsyncpa [#allocation5], 1 }

</bundles_post_ra>
